<compile_context>
chip_gen: v5e
topology: v5e:2x2
jax: 0.10.0
libtpu: 0.0.40
codegen_flags: <defaults>
</compile_context>

<pallas_src>
import functools
import math

import jax
import jax.numpy as jnp
import numpy as np
from jax.experimental import pallas as pl
from jax.experimental.pallas import tpu as pltpu

LN_EPS = 1e-12


# ----------------------------- small helpers -----------------------------
def _layer_norm(x, gamma, beta, eps=LN_EPS):
    mu = jnp.mean(x, axis=-1, keepdims=True)
    var = jnp.mean((x - mu) ** 2, axis=-1, keepdims=True)
    return (x - mu) * jax.lax.rsqrt(var + eps) * gamma + beta


def _softmax(s):
    # explicit max-subtract softmax; reciprocal goes to the EUP slot.
    s_max = jnp.max(s, axis=-1, keepdims=True)
    p = jnp.exp(s - s_max)
    return p * pl.reciprocal(jnp.sum(p, axis=-1, keepdims=True), approx=True)


def _vmem_budget():
    """VMEM budget derived from the chip, minus headroom for Mosaic scratch."""
    try:
        cap = int(pltpu.get_tpu_info().vmem_capacity_bytes)
    except Exception:
        cap = 64 * 1024 * 1024          # conservative (v7x-sized) fallback
    return max(cap - 16 * 1024 * 1024, 32 * 1024 * 1024)


def _pick_query_tile(sq, batch, vmem_bytes):
    """Generation-aware query/sequence tile: bigger tiles on 128 MiB parts."""
    cap = 1024 if vmem_bytes >= 96 * 1024 * 1024 else 512
    tq = sq
    for cand in (1024, 512, 256, 128, 64, 32, 16, 8):
        if cand <= cap and sq % cand == 0:
            tq = cand
            break
    # v7x megacore: guarantee >= 2 grid steps so both TensorCores get work.
    if batch * (sq // tq) < 2 and tq % 2 == 0:
        tq //= 2
    return tq


# ----------------------- K/V projection (hoisted) kernel -----------------------
def _kv_proj_kernel(x_ref, w_ref, b_ref, k_ref, v_ref):
    x = x_ref[0].astype(jnp.bfloat16)                           # (Ts, H)
    k = jnp.dot(x, w_ref[0], preferred_element_type=jnp.float32) + b_ref[0]
    v = jnp.dot(x, w_ref[1], preferred_element_type=jnp.float32) + b_ref[1]
    k_ref[0] = k.astype(jnp.bfloat16)
    v_ref[0] = v.astype(jnp.bfloat16)


def _project_kv(x, kv_w, kv_b, vmem_bytes):
    """K/V = x @ Wk + bk, x @ Wv + bv, computed once per call, stored bf16."""
    B, S, H = x.shape
    ts = _pick_query_tile(S, B, vmem_bytes)
    const3 = lambda b, s: (0, 0, 0)
    const2 = lambda b, s: (0, 0)
    return pl.pallas_call(
        _kv_proj_kernel,
        out_shape=(jax.ShapeDtypeStruct((B, S, H), jnp.bfloat16),
                   jax.ShapeDtypeStruct((B, S, H), jnp.bfloat16)),
        grid=(B, S // ts),
        in_specs=[
            pl.BlockSpec((1, ts, H), lambda b, s: (b, s, 0)),
            pl.BlockSpec((2, H, H), const3, pipeline_mode=pl.Buffered(1)),
            pl.BlockSpec((2, H), const2, pipeline_mode=pl.Buffered(1)),
        ],
        out_specs=(pl.BlockSpec((1, ts, H), lambda b, s: (b, s, 0)),
                   pl.BlockSpec((1, ts, H), lambda b, s: (b, s, 0))),
        compiler_params=pltpu.CompilerParams(
            dimension_semantics=("parallel", "parallel"),
            vmem_limit_bytes=vmem_bytes),
    )(x, kv_w, kv_b)


# ----------------------------- decoder-layer kernel -----------------------------
def _mha(xq, k_ref, v_ref, qo_w_ref, qo_b_ref, ln_ref, mask_add, num_heads, ctx_ref):
    """Multi-head attention (precomputed K/V) + output projection + residual LN.

    xq:       (Tq, H)    f32 query-side hidden states (also residual input)
    k_ref:    (1, Skv, H) bf16 precomputed keys
    v_ref:    (1, Skv, H) bf16 precomputed values
    qo_w_ref: (2, H, H)  bf16 stacked (Wq, Wo), stored [in, out]
    qo_b_ref: (2, H)     f32 stacked (bq, bo)
    ln_ref:   (2, H)     f32 (gamma, beta)
    mask_add: (Tq, Skv)  f32 additive mask (already broadcast), or None
    ctx_ref:  (NH, Tq, hd) f32 VMEM scratch (head-major -> aligned stores)
    """
    tq, H = xq.shape
    hd = H // num_heads
    scale = 1.0 / math.sqrt(hd)

    xq16 = xq.astype(jnp.bfloat16)
    # Q projection (bf16 MXU matmul, f32 accumulation); fold the 1/sqrt(hd) scale
    # into Q before the bf16 cast so scores need no extra multiply.
    q = (jnp.dot(xq16, qo_w_ref[0], preferred_element_type=jnp.float32)
         + qo_b_ref[0]) * scale
    q16 = q.astype(jnp.bfloat16)

    for h in range(num_heads):
        lo = h * hd
        qh = q16[:, lo:lo + hd]                    # (Tq, hd)  bf16
        kh = k_ref[0, :, lo:lo + hd]               # (Skv, hd) bf16
        vh = v_ref[0, :, lo:lo + hd]               # (Skv, hd) bf16
        # Contract the head dim directly (no explicit transpose).
        s = jax.lax.dot_general(qh, kh, (((1,), (1,)), ((), ())),
                                preferred_element_type=jnp.float32)
        if mask_add is not None:
            s = s + mask_add
        p = _softmax(s)
        # head-major scratch: leading-dim store -> full-tile, unmasked.
        ctx_ref[h] = jnp.dot(p.astype(jnp.bfloat16), vh,
                             preferred_element_type=jnp.float32)

    # Output projection: accumulate per head against sublane-aligned Wo row slices.
    acc = jnp.zeros((tq, H), jnp.float32)
    for h in range(num_heads):
        lo = h * hd
        acc = acc + jnp.dot(ctx_ref[h].astype(jnp.bfloat16),
                            qo_w_ref[1, lo:lo + hd, :],
                            preferred_element_type=jnp.float32)
    attn_out = acc + qo_b_ref[1]
    return _layer_norm(attn_out + xq, ln_ref[0], ln_ref[1])


def _decoder_layer_kernel(xq_ref, ks_ref, vs_ref, kc_ref, vc_ref, mask_ref,
                          sqo_w_ref, sqo_b_ref, sln_ref,
                          cqo_w_ref, cqo_b_ref, cln_ref,
                          w1_ref, b1_ref, w2_ref, b2_ref, fln_ref,
                          out_ref, ctx_ref, *, num_heads):
    xq = xq_ref[0]                               # (Tq, H) f32 query tile / residual
    tq = xq.shape[0]
    sk = kc_ref.shape[1]

    # Encoder padding mask: additive form built & broadcast ONCE per invocation
    # (reused by every cross-attention head; no per-head re-broadcast).
    mask_add = jnp.broadcast_to((1.0 - mask_ref[0]) * -10000.0, (tq, sk))

    # --- self attention (no mask, matching the reference module) + residual LN
    a1 = _mha(xq, ks_ref, vs_ref, sqo_w_ref, sqo_b_ref, sln_ref,
              None, num_heads, ctx_ref)

    # --- cross attention over encoder states (additive encoder mask) + residual LN
    a2 = _mha(a1, kc_ref, vc_ref, cqo_w_ref, cqo_b_ref, cln_ref,
              mask_add, num_heads, ctx_ref)

    # --- feed-forward: GELU(a2 W1 + b1) W2 + b2, residual LN
    a2_16 = a2.astype(jnp.bfloat16)
    inter = jnp.dot(a2_16, w1_ref[...], preferred_element_type=jnp.float32) + b1_ref[...]
    # exact (erf) gelu like HF "gelu"; switch to approximate=True only if a bundle
    # dump shows the single EUP slot saturating ahead of the MXU.
    inter = jax.nn.gelu(inter, approximate=False)
    ffn = jnp.dot(inter.astype(jnp.bfloat16), w2_ref[...],
                  preferred_element_type=jnp.float32) + b2_ref[...]
    out = _layer_norm(ffn + a2, fln_ref[0], fln_ref[1])

    out_ref[0] = out.astype(out_ref.dtype)


# ----------------------------- host-side wrappers -----------------------------
def prepare_decoder_params(params):
    """One-time param prep: bf16 weight casts + Q/O vs K/V split (hoisted out of
    the per-forward path so no HBM-wide convert runs on every call)."""
    bf16 = jnp.bfloat16

    def split_attn(w, b, ln):
        return {
            "qo_w": jnp.stack([w[0], w[3]]).astype(bf16),     # (2, H, H) Wq, Wo
            "qo_b": jnp.stack([b[0], b[3]]).astype(jnp.float32),
            "kv_w": w[1:3].astype(bf16),                      # (2, H, H) Wk, Wv
            "kv_b": b[1:3].astype(jnp.float32),
            "ln": ln.astype(jnp.float32),
        }

    return {
        "self": split_attn(params["self_w"], params["self_b"], params["self_ln"]),
        "cross": split_attn(params["cross_w"], params["cross_b"], params["cross_ln"]),
        "ffn_w1": params["ffn_w1"].astype(bf16),
        "ffn_b1": params["ffn_b1"].astype(jnp.float32),
        "ffn_w2": params["ffn_w2"].astype(bf16),
        "ffn_b2": params["ffn_b2"].astype(jnp.float32),
        "ffn_ln": params["ffn_ln"].astype(jnp.float32),
    }


def bert_decoder_layer(hidden_states, encoder_hidden_states, encoder_attention_mask,
                       prep, num_heads):
    """Pallas implementation of BertDecoderLayer.forward (returns layer_output)."""
    B, Sq, H = hidden_states.shape
    _, Sk, _ = encoder_hidden_states.shape
    I = prep["ffn_w1"].shape[1]
    hd = H // num_heads

    vmem_bytes = _vmem_budget()
    tq = _pick_query_tile(Sq, B, vmem_bytes)
    n_q = Sq // tq

    # K/V projections hoisted out of the query-tile grid (computed once per call,
    # stored bf16 -> the per-tile kernel streams bf16 K/V instead of recomputing).
    k_self, v_self = _project_kv(hidden_states,
                                 prep["self"]["kv_w"], prep["self"]["kv_b"], vmem_bytes)
    k_cross, v_cross = _project_kv(encoder_hidden_states,
                                   prep["cross"]["kv_w"], prep["cross"]["kv_b"],
                                   vmem_bytes)

    # Raw 0/1 encoder mask; the (1-m)*-1e4 additive mask is computed in-kernel
    # so a (B, Sq, Sk) f32 tensor is never materialized / streamed from HBM.
    m = encoder_attention_mask.astype(jnp.float32)
    if m.ndim == 2:          # (B, Sk): broadcast over query positions in-kernel
        m = m[:, None, :]
        mask_spec = pl.BlockSpec((1, 1, Sk), lambda b, q: (b, 0, 0))
    elif m.ndim == 3:        # (B, Sq, Sk): tile along the query axis
        mask_spec = pl.BlockSpec((1, tq, Sk), lambda b, q: (b, q, 0))
    else:
        raise ValueError("Wrong shape for encoder_attention_mask")

    kernel = functools.partial(_decoder_layer_kernel, num_heads=num_heads)

    const3 = lambda b, q: (0, 0, 0)
    const2 = lambda b, q: (0, 0)
    # constant-index operands: single-buffered (double-buffering them only wastes VMEM)
    wspec3 = lambda shape: pl.BlockSpec(shape, const3, pipeline_mode=pl.Buffered(1))
    wspec2 = lambda shape: pl.BlockSpec(shape, const2, pipeline_mode=pl.Buffered(1))

    in_specs = [
        pl.BlockSpec((1, tq, H), lambda b, q: (b, q, 0)),   # query tile (f32, residual)
        pl.BlockSpec((1, Sq, H), lambda b, q: (b, 0, 0)),   # self-attn K (bf16)
        pl.BlockSpec((1, Sq, H), lambda b, q: (b, 0, 0)),   # self-attn V (bf16)
        pl.BlockSpec((1, Sk, H), lambda b, q: (b, 0, 0)),   # cross-attn K (bf16)
        pl.BlockSpec((1, Sk, H), lambda b, q: (b, 0, 0)),   # cross-attn V (bf16)
        mask_spec,                                          # raw 0/1 encoder mask
        wspec3((2, H, H)),   # self-attn Wq/Wo (bf16)
        wspec2((2, H)),      # self-attn bq/bo
        wspec2((2, H)),      # self-attn LN
        wspec3((2, H, H)),   # cross-attn Wq/Wo (bf16)
        wspec2((2, H)),      # cross-attn bq/bo
        wspec2((2, H)),      # cross-attn LN
        wspec2((H, I)),      # FFN W1 (bf16)
        wspec2((1, I)),      # FFN b1
        wspec2((I, H)),      # FFN W2 (bf16)
        wspec2((1, H)),      # FFN b2
        wspec2((2, H)),      # FFN LN
    ]

    out = pl.pallas_call(
        kernel,
        out_shape=jax.ShapeDtypeStruct((B, Sq, H), hidden_states.dtype),
        grid=(B, n_q),
        in_specs=in_specs,
        out_specs=pl.BlockSpec((1, tq, H), lambda b, q: (b, q, 0)),
        scratch_shapes=[pltpu.VMEM((num_heads, tq, hd), jnp.float32)],  # head-major ctx
        compiler_params=pltpu.CompilerParams(
            dimension_semantics=("parallel", "parallel"),
            vmem_limit_bytes=vmem_bytes),
    )(hidden_states, k_self, v_self, k_cross, v_cross, m,
      prep["self"]["qo_w"], prep["self"]["qo_b"], prep["self"]["ln"],
      prep["cross"]["qo_w"], prep["cross"]["qo_b"], prep["cross"]["ln"],
      prep["ffn_w1"], prep["ffn_b1"], prep["ffn_w2"], prep["ffn_b2"],
      prep["ffn_ln"])
    return out


# ---------------- pure-JAX f32 reference (for correctness check) ----------------
def _reference(hidden_states, encoder_hidden_states, encoder_attention_mask,
               params, num_heads):
    B, Sq, H = hidden_states.shape
    _, Sk, _ = encoder_hidden_states.shape
    hd = H // num_heads

    def mha(xq, xkv, w, b, ln, mask_add):
        q = xq @ w[0] + b[0]
        k = xkv @ w[1] + b[1]
        v = xkv @ w[2] + b[2]
        q = q.reshape(*q.shape[:-1], num_heads, hd)
        k = k.reshape(*k.shape[:-1], num_heads, hd)
        v = v.reshape(*v.shape[:-1], num_heads, hd)
        s = jnp.einsum("bqnd,bknd->bnqk", q, k) / math.sqrt(hd)
        if mask_add is not None:
            s = s + mask_add
        p = jax.nn.softmax(s, axis=-1)
        ctx = jnp.einsum("bnqk,bknd->bqnd", p, v).reshape(xq.shape[0], -1, H)
        out = ctx @ w[3] + b[3]
        return _layer_norm(out + xq, ln[0], ln[1])

    m = encoder_attention_mask.astype(jnp.float32)
    if m.ndim == 2:
        ext = m[:, None, None, :]
    else:
        ext = m[:, None, :, :]
    ext = (1.0 - ext) * -10000.0

    a1 = mha(hidden_states, hidden_states,
             params["self_w"], params["self_b"], params["self_ln"], None)
    a2 = mha(a1, encoder_hidden_states,
             params["cross_w"], params["cross_b"], params["cross_ln"], ext)
    inter = jax.nn.gelu(a2 @ params["ffn_w1"] + params["ffn_b1"][0], approximate=False)
    ffn = inter @ params["ffn_w2"] + params["ffn_b2"][0]
    return _layer_norm(ffn + a2, params["ffn_ln"][0], params["ffn_ln"][1])


def _init_params(key, H, I):
    ks = jax.random.split(key, 8)
    std = 0.02
    return {
        "self_w":  jax.random.normal(ks[0], (4, H, H), jnp.float32) * std,
        "self_b":  jax.random.normal(ks[1], (4, H), jnp.float32) * std,
        "self_ln": jnp.stack([jnp.ones((H,), jnp.float32),
                              jnp.zeros((H,), jnp.float32)]),
        "cross_w":  jax.random.normal(ks[2], (4, H, H), jnp.float32) * std,
        "cross_b":  jax.random.normal(ks[3], (4, H), jnp.float32) * std,
        "cross_ln": jnp.stack([jnp.ones((H,), jnp.float32),
                               jnp.zeros((H,), jnp.float32)]),
        "ffn_w1": jax.random.normal(ks[4], (H, I), jnp.float32) * std,
        "ffn_b1": jax.random.normal(ks[5], (1, I), jnp.float32) * std,
        "ffn_w2": jax.random.normal(ks[6], (I, H), jnp.float32) * std,
        "ffn_b2": jax.random.normal(ks[7], (1, H), jnp.float32) * std,
        "ffn_ln": jnp.stack([jnp.ones((H,), jnp.float32),
                             jnp.zeros((H,), jnp.float32)]),
    }


if __name__ == "__main__":
    B, Sq, Sk, H, I, NH = 2, 8, 16, 32, 64, 4

    key = jax.random.PRNGKey(0)
    k_h, k_e, k_m, k_p = jax.random.split(key, 4)

    hidden_states = jax.random.normal(k_h, (B, Sq, H), jnp.float32)
    encoder_hidden_states = jax.random.normal(k_e, (B, Sk, H), jnp.float32)
    # 2-D attention mask of 1/0 (last few encoder positions padded out in batch 1)
    encoder_attention_mask = jnp.ones((B, Sk), jnp.float32).at[1, Sk - 4:].set(0.0)

    params = _init_params(k_p, H, I)
    prep = prepare_decoder_params(params)   # bf16 weight casts done once, not per call

    out = bert_decoder_layer(hidden_states, encoder_hidden_states,
                             encoder_attention_mask, prep, NH)
    out = jax.block_until_ready(out)

    ref = _reference(hidden_states, encoder_hidden_states,
                     encoder_attention_mask, params, NH)
    # bf16 matmul operands (f32 accumulation) + approx reciprocal -> loosened tolerance.
    np.testing.assert_allclose(np.asarray(out), np.asarray(ref), rtol=2e-2, atol=2e-2)

    # TODO(synk): attention-probability outputs (output_attentions=True) are not returned.
    print("KERNEL_OK")
</pallas_src>

<mosaic_0001>
module attributes {stable_mosaic.version = 11 : i64} {
  func.func @_kv_proj_kernel(%arg0: i32, %arg1: i32, %arg2: memref<1x8x32xf32, #tpu.memory_space<vmem>>, %arg3: memref<2x32x32xbf16, #tpu.memory_space<vmem>>, %arg4: memref<2x32xf32, #tpu.memory_space<vmem>>, %arg5: memref<1x8x32xbf16, #tpu.memory_space<vmem>>, %arg6: memref<1x8x32xbf16, #tpu.memory_space<vmem>>) attributes {dimension_semantics = [#tpu.dimension_semantics<parallel>, #tpu.dimension_semantics<parallel>], iteration_bounds = array<i64: 2, 1>, scalar_prefetch = 0 : i64, scratch_operands = 0 : i64, tpu.core_type = #tpu.core_type<tc>, window_params = [{transform_indices = @transform_0, window_bounds = array<i64: 1, 8, 32>}, {pipeline_mode = #tpu.pipeline_mode<synchronous>, transform_indices = @transform_1, window_bounds = array<i64: 2, 32, 32>}, {pipeline_mode = #tpu.pipeline_mode<synchronous>, transform_indices = @transform_2, window_bounds = array<i64: 2, 32>}, {transform_indices = @transform_3, window_bounds = array<i64: 1, 8, 32>}, {transform_indices = @transform_4, window_bounds = array<i64: 1, 8, 32>}]} {
    %c0 = arith.constant 0 : index
    %c0_0 = arith.constant 0 : index
    %c0_1 = arith.constant 0 : index
    %0 = vector.load %arg2[%c0, %c0_0, %c0_1] : memref<1x8x32xf32, #tpu.memory_space<vmem>>, vector<1x8x32xf32>
    %1 = vector.shape_cast %0 : vector<1x8x32xf32> to vector<8x32xf32>
    %2 = arith.truncf %1 : vector<8x32xf32> to vector<8x32xbf16>
    %c0_2 = arith.constant 0 : index
    %c0_3 = arith.constant 0 : index
    %c0_4 = arith.constant 0 : index
    %3 = vector.load %arg3[%c0_2, %c0_3, %c0_4] : memref<2x32x32xbf16, #tpu.memory_space<vmem>>, vector<1x32x32xbf16>
    %4 = vector.shape_cast %3 : vector<1x32x32xbf16> to vector<32x32xbf16>
    %cst = arith.constant dense<0.000000e+00> : vector<8x32xf32>
    %5 = tpu.matmul %2, %4, %cst {dimension_numbers = #tpu.dot_dimension_numbers<[1], [0], [0], [1], [0, 0, 1, 1], [], []>} : vector<8x32xbf16>, vector<32x32xbf16>, vector<8x32xf32> -> vector<8x32xf32>
    %c0_5 = arith.constant 0 : index
    %c0_6 = arith.constant 0 : index
    %6 = vector.load %arg4[%c0_5, %c0_6] : memref<2x32xf32, #tpu.memory_space<vmem>>, vector<1x32xf32>
    %7 = vector.shape_cast %6 : vector<1x32xf32> to vector<32xf32>
    %8 = vector.shape_cast %7 : vector<32xf32> to vector<1x32xf32>
    %9 = vector.broadcast %8 : vector<1x32xf32> to vector<8x32xf32>
    %10 = arith.addf %5, %9 : vector<8x32xf32>
    %c1 = arith.constant 1 : index
    %c0_7 = arith.constant 0 : index
    %c0_8 = arith.constant 0 : index
    %11 = vector.load %arg3[%c1, %c0_7, %c0_8] : memref<2x32x32xbf16, #tpu.memory_space<vmem>>, vector<1x32x32xbf16>
    %12 = vector.shape_cast %11 : vector<1x32x32xbf16> to vector<32x32xbf16>
    %cst_9 = arith.constant dense<0.000000e+00> : vector<8x32xf32>
    %13 = tpu.matmul %2, %12, %cst_9 {dimension_numbers = #tpu.dot_dimension_numbers<[1], [0], [0], [1], [0, 0, 1, 1], [], []>} : vector<8x32xbf16>, vector<32x32xbf16>, vector<8x32xf32> -> vector<8x32xf32>
    %c1_10 = arith.constant 1 : index
    %c0_11 = arith.constant 0 : index
    %14 = vector.load %arg4[%c1_10, %c0_11] : memref<2x32xf32, #tpu.memory_space<vmem>>, vector<1x32xf32>
    %15 = vector.shape_cast %14 : vector<1x32xf32> to vector<32xf32>
    %16 = vector.shape_cast %15 : vector<32xf32> to vector<1x32xf32>
    %17 = vector.broadcast %16 : vector<1x32xf32> to vector<8x32xf32>
    %18 = arith.addf %13, %17 : vector<8x32xf32>
    %19 = arith.truncf %10 : vector<8x32xf32> to vector<8x32xbf16>
    %c0_12 = arith.constant 0 : index
    %c0_13 = arith.constant 0 : index
    %c0_14 = arith.constant 0 : index
    %20 = vector.load %arg5[%c0_12, %c0_13, %c0_14] : memref<1x8x32xbf16, #tpu.memory_space<vmem>>, vector<1x8x32xbf16>
    %21 = vector.shape_cast %20 : vector<1x8x32xbf16> to vector<8x32xbf16>
    %22 = vector.shape_cast %19 : vector<8x32xbf16> to vector<1x8x32xbf16>
    tpu.vector_store %arg5[%c0_12, %c0_13, %c0_14], %22 {strides = array<i32>} : memref<1x8x32xbf16, #tpu.memory_space<vmem>>, vector<1x8x32xbf16>,
    %23 = arith.truncf %18 : vector<8x32xf32> to vector<8x32xbf16>
    %c0_15 = arith.constant 0 : index
    %c0_16 = arith.constant 0 : index
    %c0_17 = arith.constant 0 : index
    %24 = vector.load %arg6[%c0_15, %c0_16, %c0_17] : memref<1x8x32xbf16, #tpu.memory_space<vmem>>, vector<1x8x32xbf16>
    %25 = vector.shape_cast %24 : vector<1x8x32xbf16> to vector<8x32xbf16>
    %26 = vector.shape_cast %23 : vector<8x32xbf16> to vector<1x8x32xbf16>
    tpu.vector_store %arg6[%c0_15, %c0_16, %c0_17], %26 {strides = array<i32>} : memref<1x8x32xbf16, #tpu.memory_space<vmem>>, vector<1x8x32xbf16>,
    return
  }
  func.func @transform_0(%arg0: i32, %arg1: i32) -> (i32, i32, i32) {
    %c0_i32 = arith.constant 0 : i32
    %c0_i32_0 = arith.constant 0 : i32
    return %arg0, %arg1, %c0_i32 : i32, i32, i32
  }
  func.func @transform_1(%arg0: i32, %arg1: i32) -> (i32, i32, i32) {
    %c0_i32 = arith.constant 0 : i32
    %c0_i32_0 = arith.constant 0 : i32
    %c0_i32_1 = arith.constant 0 : i32
    %c0_i32_2 = arith.constant 0 : i32
    return %c0_i32, %c0_i32_0, %c0_i32_1 : i32, i32, i32
  }
  func.func @transform_2(%arg0: i32, %arg1: i32) -> (i32, i32) {
    %c0_i32 = arith.constant 0 : i32
    %c0_i32_0 = arith.constant 0 : i32
    %c0_i32_1 = arith.constant 0 : i32
    return %c0_i32, %c0_i32_0 : i32, i32
  }
  func.func @transform_3(%arg0: i32, %arg1: i32) -> (i32, i32, i32) {
    %c0_i32 = arith.constant 0 : i32
    %c0_i32_0 = arith.constant 0 : i32
    return %arg0, %arg1, %c0_i32 : i32, i32, i32
  }
  func.func @transform_4(%arg0: i32, %arg1: i32) -> (i32, i32, i32) {
    %c0_i32 = arith.constant 0 : i32
    %c0_i32_0 = arith.constant 0 : i32
    return %arg0, %arg1, %c0_i32 : i32, i32, i32
  }
}

</mosaic_0001>

<bundles_post_ra>
// kernel: tpu_custom_call.1
= control target key start
LH: loop header
LB: loop body
LE: loop exit
PB: predicated region body
PF: predicated region fallthrough
CT: control target
= control target key end

     0   :  { %10 = vsyncpa [#allocation3], 0  ;;  %s1062_s0 = inlined_call_operand.hbm [shape: f32[2,8,32], index: 0, kind: input, shape index: {}]   ;;  %s1063_s1 = inlined_call_operand.hbm [shape: bf16[2,32,32], index: 1, kind: input, shape index: {}]   ;;  %s1064_s2 = inlined_call_operand.hbm [shape: f32[2,32], index: 2, kind: input, shape index: {}]   ;;  %s1065_s3 = inlined_call_operand.hbm [shape: bf16[2,8,32], index: 3, kind: output, shape index: {0}]   ;;  %s1066_s4 = inlined_call_operand.hbm [shape: bf16[2,8,32], index: 4, kind: output, shape index: {1}]  }
   0x1   :  { %12 = vsyncpa [#allocation3 + $0x1], 0 }
   0x2   :  { %13 = vsyncpa [#allocation6], 0 }
   0x3   :  { %14 = vsyncpa [#allocation4], 0 }
   0x4   :  { %16 = vsyncpa [#allocation4 + $0x1], 0 }
   0x5   :  { %17 = vsyncpa [#allocation10], 0 }
   0x6   :  { %19 = vsyncpa [#allocation10 + $0x1], 0  ;;  %s894_s15 = smov 0   ;;  %s896_s16 = smov 0  }
   0x7   :  { %s898_s17 = smov 0   ;;  %s900_s18 = smov 0  }
   0x8   :  { %s902_s19 = smov 0   ;;  %s904_s20 = smov 0  }
   0x9 LB: > { %s521_s21 = sadd.s32 4294967295, %s863_s20   ;;  %p523_p0 = scmp.ge.s32.totalorder %s863_s20, 1  ;;  %s863_s20 = sphi %s904_s20, %s25_s20   ;;  %s859_s19 = sphi %s902_s19, %s1076_s19   ;;  %s855_s18 = sphi %s900_s18, %s1075_s18   ;;  %s851_s17 = sphi %s898_s17, %s1074_s17   ;;  %s847_s16 = sphi %s896_s16, %s1073_s16   ;;  %s843_s15 = sphi %s894_s15, %s1072_s15  }
   0xa   : > { %p928_p1 = scmp.eq.s32.totalorder %s521_s21, 0  ;;  %p168_p2 = scmp.lt.s32.totalorder %s863_s20, 3 }
   0xb   : > { %s179_s25 = sshll.u32 %s1063_s1, 4  ;;  %s865_s27 = smov [#allocation5]   ;;  %s180_s25 = int_to_ptr.hbm [resolvable:$true] %s179_s25 }
   0xc   : > { %p936_p3 = pnand %p523_p0, %p168_p2  ;;  %s181_s28 = sshll.u32 %s865_s27, 4  ;;  %s182_s28 = int_to_ptr.vmem [resolvable:$true] %s181_s28 }
   0xd   : > { %p526_p6 = scmp.ge.s32.totalorder %s863_s20, 2  ;;  %s194_s5 = sshll.u32 %s1064_s2, 4  ;;  %s195_s5 = int_to_ptr.hbm [resolvable:$true] %s194_s5 }
   0xe   : > { %p577_p4 = pneg %p936_p3  ;;  %s866_s6 = smov 64  }
   0xf   : > { %s867_s7 = smov 4   ;;  %s868_s8 = smov [#allocation7]  }
  0x10   : > { %p578_p5 = pnand %p577_p4, %p928_p1  ;;  %s196_s9 = sshll.u32 %s868_s8, 4  ;;  %s197_s9 = int_to_ptr.vmem [resolvable:$true] %s196_s9 }
  0x11   : > { %s37_s10 = sadd.s32 1, %s859_s19  ;;  %s522_s11 = sadd.s32 4294967294, %s863_s20  }
  0x12   : > { %580 = dma.hbm_to_vmem [thread:$0]  (!%p578_p5), %s180_s25, 512, %s182_s28, [#allocation6], %s866_s6, %s866_s6, %s867_s7  }
  0x13   : > { %583 = dma.hbm_to_vmem [thread:$0]  (!%p578_p5), %s195_s5, 32, %s197_s9, [#allocation6]  }
  0x14   : > { %p39_p7 = scmp.ge.s32.totalorder %s37_s10, 2  ;;  %s46_s12 = sadd.s32 1, %s851_s17 }
  0x15   : > { %p53_p8 = scmp.ne.s32.totalorder %s851_s17, %s847_s16  ;;  %p54_p9 = scmp.eq.s32.totalorder %s863_s20, 0 }
  0x16   : > { %s1078_s10 = smov (%p39_p7, %s37_s10), 0  ;;  %p59_p10 = scmp.ne.s32.totalorder %s847_s16, %s843_s15 }
  0x17   : > { %s41_s13 = ssub.s32 %s859_s19, %s1078_s10  ;;  %p127_p11 = scmp.eq.s32.totalorder %s521_s21, 1 }
  0x18   : > { %p44_p12 = scmp.eq.s32.totalorder %s41_s13, 0  ;;  %p964_p13 = por %p928_p1, %p59_p10 }
  0x19   : > { %p968_p0 = por %p127_p11, %p53_p8  ;;  %p133_p2 = scmp.eq.s32.totalorder %s522_s11, 1 }
  0x1a   : > { %s973_s24 = scalar_select %p44_p12, %s851_s17, %s46_s12  }
  0x1b   : > { %p55_p4 = por %p54_p9, %p53_p8  ;;  %p975_p5 = por %p133_p2, %p59_p10 }
  0x1c   : > { %s207_s27 = sand.u32 1, %s851_s17   ;;  %s528_s21 = sshll.u32 %s859_s19, 3 }
  0x1d   : > { %p597_p7 = scmp.lt.s32.totalorder %s863_s20, 2  ;;  %s527_s28 = sshll.u32 %s207_s27, 3 }
  0x1e   : > { %s216_s5 = scalar_lea.hbm %s1062_s0, %s528_s21  ;;  %s211_s7 = scalar_lea.vmem [#allocation2], %s527_s28 }
  0x1f   : > { %s218_s6 = sshll.u32 %s216_s5, 4  ;;  %s220_s8 = sshll.u32 %s211_s7, 4  ;;  %s219_s6 = int_to_ptr.hbm [resolvable:$true] %s218_s6  ;;  %s221_s8 = int_to_ptr.vmem [resolvable:$true] %s220_s8 }
  0x20   : > { %p585_p11 = pnand %p597_p7, %p55_p4  ;;  %s208_s9 = scalar_lea.sflag [#allocation3], %s207_s27 }
  0x21   : > { %229 = sbr.rel (%p936_p3) target bundleno = 194 (0xc2), region = 32  ;;  %s988_s11 = sand.u32 (!%p936_p3), 1, %s847_s16  }
  0x22   : > { %587 = dma.hbm_to_vmem [thread:$0]  (!%p585_p11), %s219_s6, 128, %s221_s8, %s208_s9  }
  0x23   : > { %s530_s12 = sshll.u32 (!%p936_p3), %s988_s11, 3  ;;  %s232_s13 = scalar_lea.sflag (!%p936_p3), [#allocation3], %s988_s11 }
  0x24   : > { %s235_s21 = scalar_lea.vmem (!%p936_p3), [#allocation2], %s530_s12 }
  0x26   : > { %826 = dma.done.wait (%p964_p13), %s232_s13, 128  }
  0x27   : > { %828 = vsyncadd (%p964_p13), %s232_s13, 4294967168 }
  0x28   : > { %830 = dma.done.wait (%p928_p1), [#allocation6], 544  }
  0x29   : > { %832 = vsyncadd (%p928_p1), [#allocation6], 4294966752  ;;  %v560_v0 = vld [vmem:[#allocation5 + $0x8] sm:$0xff]  ;;  %v562_v1 = vld [vmem:[#allocation5 + $0x18] sm:$0xff]  ;;  %vm297_vm0 = vcmask 261120   ;;  %s533_s26 = sshll.u32 %s988_s11, 2 }
  0x2a   : > { %v559_v2 = vld [vmem:[#allocation5] sm:$0xff]  ;;  %307 = vmatpush.bf16.msra.mxu0 %v560_v0  ;;  %339 = vmatpush.bf16.msra.mxu1 %v562_v1  ;;  %v561_v3 = vld [vmem:[#allocation5 + $0x10] sm:$0xff]  ;;  %s555_s14 = sshll.u32 %s855_s18, 2  ;;  %s268_s6 = scalar_lea.vmem [#allocation8], %s533_s26  ;;  %vm347_vm1 = vcmask 257024  }
  0x2b   : > { %v277_v4 = vld [vmem:[%s235_s21] sm:$0xff]  ;;  %v653_v6 = vld [vmem:[#allocation7] ss:$0 sm:$0xff]  ;;  %v654_v7 = vld [vmem:[#allocation7 + $0x1] ss:$0 sm:$0xff]  ;;  %s368_s28 = scalar_lea.hbm %s1065_s3, %s555_s14  ;;  %s383_s5 = scalar_lea.hbm %s1066_s4, %s555_s14 }
  0x2c   : > { %v278_v5 = vpack.c.bf16 %v277_v4, %v277_v4  ;;  %s370_s7 = sshll.u32 %s268_s6, 4  ;;  %s372_s8 = sshll.u32 %s368_s28, 4  ;;  %s371_s7 = int_to_ptr.vmem [resolvable:$true] %s370_s7  ;;  %s373_s8 = int_to_ptr.hbm [resolvable:$true] %s372_s8 }
  0x2d   : > { %s275_s9 = scalar_lea.vmem [#allocation9], %s533_s26  ;;  %s387_s12 = sshll.u32 %s383_s5, 4  ;;  %s1010_s12 = int_to_ptr.hbm [resolvable:$true] %s387_s12 }
  0x2e   : > { %308 = vmatpush.bf16.msra.mxu0 %v559_v2  ;;  %340 = vmatpush.bf16.msra.mxu1 %v561_v3  ;;  %s385_s18 = sshll.u32 %s275_s9, 4  ;;  %s352_s13 = scalar_lea.sflag [#allocation4], %s988_s11  ;;  %s1008_s18 = int_to_ptr.vmem [resolvable:$true] %s385_s18 }
  0x2f   : > { %s759_s21 = sshra.s32 %s373_s8, 4  ;;  %s765_s27 = scalar_lea.hbm %s1065_s3, 8  ;;  %s760_s21 = int_to_ptr.hbm [resolvable:$true] %s759_s21 }
  0x30   : > { %s761_s14 = scalar_lea.hbm %s760_s21, 4  ;;  %p766_p9 = scmp.lt.s32.totalorder %s760_s21, %s1065_s3 }
  0x31   : > { %543 = vmatmul.msk.bf16.vlgmr.msra.gmra.mxu0 %vm297_vm0, %v278_v5  ;;  %552 = vmatmul.msk.bf16.vlgmr.msra.gmra.mxu1 %vm297_vm0, %v278_v5  ;;  %p762_p1 = scmp.ne.s32.totalorder %s760_s21, %s761_s14  ;;  %p767_p10 = scmp.lt.s32.totalorder %s765_s27, %s761_s14 }
  0x33   : > { %p763_p3 = pnand %p762_p1, %p968_p0  ;;  %p768_p12 = por %p767_p10, %p766_p9 }
  0x35   : > { %p764_p8 = pneg %p763_p3 }
  0x37   : > { %p769_p13 = pnand %p768_p12, %p764_p8 }
  0xae   : > { %v310_v8 = vpop.f32.mrf.mxu0  ;;  %v342_v9 = vpop.f32.mrf.mxu1 }
  0xaf   : > { %v311_v10 = vadd.f32 %v653_v6, %v310_v8  ;;  %v343_v11 = vadd.f32 %v654_v7, %v342_v9 }
  0xb1   : > { %v346_v12 = vpack.c.bf16 %v311_v10, %v311_v10  ;;  %v349_v13 = vpack.c.bf16 %v343_v11, %v343_v11 }
  0xb3   : > { %348 = vst.msk [vmem:[%s268_s6] sm:$0xf] %vm347_vm1, %v346_v12 }
  0xb4   : > { %772 = shalt.err (!%p769_p13)
}
  0xb5   : > { %573 = dma.vmem_to_hbm [thread:$0]  (%p968_p0), %s371_s7, 64, %s373_s8, %s352_s13   ;;  %350 = vst.msk [vmem:[%s275_s9] sm:$0xf] %vm347_vm1, %v349_v13 }
  0xb6   : > { %s357_s30 = scalar_lea.sflag [#allocation10], %s988_s11  ;;  %s787_s5 = sshra.s32 %s1010_s12, 4  ;;  %s788_s5 = int_to_ptr.hbm [resolvable:$true] %s787_s5 }
  0xb7   : > { %s789_s6 = scalar_lea.hbm %s788_s5, 4  ;;  %s793_s26 = scalar_lea.hbm %s1066_s4, 8 }
  0xb8   : > { %p790_p2 = scmp.ne.s32.totalorder %s788_s5, %s789_s6  ;;  %p794_p11 = scmp.lt.s32.totalorder %s788_s5, %s1066_s4 }
  0xb9   : > { %p795_p1 = scmp.lt.s32.totalorder %s793_s26, %s789_s6 }
  0xba   : > { %p791_p4 = pnand %p790_p2, %p968_p0 }
  0xbb   : > { %p796_p3 = por %p795_p1, %p794_p11 }
  0xbc   : > { %p792_p7 = pneg %p791_p4 }
  0xbe   : > { %p797_p8 = pnand %p796_p3, %p792_p7 }
  0xc0   : > { %800 = shalt.err (!%p797_p8)
}
  0xc1   : > { %574 = dma.vmem_to_hbm [thread:$0]  (%p968_p0), %s1008_s18, 64, %s1010_s12, %s357_s30   ;;  %v312_v14 = vpop.f32.mrf.mxu0  ;;  %v344_v15 = vpop.f32.mrf.mxu1 }
  0xc2 PF: > { %s399_s11 = sand.u32 1, %s843_s15   ;;  %p589_p9 = pnand %p526_p6, %p975_p5 }
  0xc3   : > { %s400_s7 = scalar_lea.sflag [#allocation4], %s399_s11 }
  0xc4   : > { %p590_p10 = pneg %p589_p9 }
  0xc6   : > { %834 = dma.done.wait (%p590_p10), %s400_s7, 64  }
  0xc7   : > { %836 = vsyncadd (%p590_p10), %s400_s7, 4294967232  ;;  %s410_s8 = scalar_lea.sflag [#allocation10], %s399_s11 }
  0xc8   : > { %838 = dma.done.wait (%p590_p10), %s410_s8, 64  }
  0xc9   : > { %840 = vsyncadd (%p590_p10), %s410_s8, 4294967232  ;;  %s25_s20 = sadd.s32 1, %s863_s20   ;;  %s1072_s15 = smov %s847_s16 }
  0xca   : > { %p22_p0 = scmp.ge.s32.totalorder %s25_s20, 4   ;;  %s1073_s16 = smov %s851_s17 }
  0xcb   : > { %s1074_s17 = smov %s973_s24  ;;  %s1075_s18 = smov %s859_s19 }
  0xcc   : > { %s1076_s19 = smov %s1078_s10  ;;  %24 = sbr.rel (!%p22_p0) target bundleno = 9 (0x9), region = 103 }
  0xd1   :  { %416 = vsyncpa [#allocation3], 1 }
  0xd2   :  { %418 = vsyncpa [#allocation3 + $0x1], 1 }
  0xd3   :  { %419 = vsyncpa [#allocation6], 1 }
  0xd4   :  { %420 = vsyncpa [#allocation4], 1 }
  0xd5   :  { %422 = vsyncpa [#allocation4 + $0x1], 1 }
  0xd6   :  { %423 = vsyncpa [#allocation10], 1 }
  0xd7   :  { %425 = vsyncpa [#allocation10 + $0x1], 1 }

</bundles_post_ra>
